<compile_context>
chip_gen: v7x
topology: tpu7x:2x2x1
jax: 0.10.0
libtpu: 0.0.40
codegen_flags: <defaults>
</compile_context>

<pallas_src>
import numpy as np
import jax
import jax.numpy as jnp
from jax.experimental import pallas as pl
from jax.experimental.pallas import tpu as pltpu


# ---- stand-ins for config['model'][...] -------------------------------------
INPUT_DIM = 3          # "input_dim" in the original script
AUGMENT_DIM = 1        # config['model']['augment_dim']
HIDDEN_DIM = 32        # config['model']['hidden_dim']
NUM_LAYERS = 3         # config['model']['num_layers']

STATE_DIM = INPUT_DIM - 1          # feature dim F of z (required by the final cat)
NET_IN_DIM = 1 + 2 * STATE_DIM     # features fed to the first Linear by forward()
NET_OUT_DIM = INPUT_DIM + AUGMENT_DIM


# ------------------------------ Pallas kernel --------------------------------
def _odefunc_kernel(t_ref, yv_ref, w1_ref, w1t_ref, b1_ref, *rest):
    """Feature-major MLP on one batch tile.

    yv_ref : (2F, TILE) f32   [y feats ; v feats], batch on the 128-lane axis
    w1     : (H, 2F)    bf16  first layer, y/v input rows fused
    w1t    : (H, 1)     f32   first-layer column that multiplies t
    b1     : (H, 1)     f32
    rest   : (wt_i, b_i) for the remaining Linears; wt_i is (out, in) bf16
             (last one pre-sliced to the used rows), b_i is (out, 1) f32;
             followed by out_ref of shape (F, TILE).
    """
    out_ref = rest[-1]
    layer_refs = rest[:-1]

    t = t_ref[0]                                           # scalar from SMEM

    # Layer 1: fold t into the bias, consume [y;v] directly (no concat,
    # no VMEM scratch roundtrip, single MXU pass).
    b1_eff = b1_ref[...] + t * w1t_ref[...]                # (H, 1) f32
    yv = yv_ref[...].astype(jnp.bfloat16)                  # (2F, TILE)
    h = jnp.dot(w1_ref[...], yv,
                preferred_element_type=jnp.float32) + b1_eff
    h = jnp.tanh(h)

    # Remaining layers: Linear (+ Tanh on all but the last one).  Static
    # Python loop -> fully unrolled at trace time (3 tiny layers).
    n_rest = len(layer_refs) // 2
    for i in range(n_rest):
        wt = layer_refs[2 * i][...]                        # (out, in) bf16
        b = layer_refs[2 * i + 1][...]                     # (out, 1)  f32
        h = jnp.dot(wt, h.astype(jnp.bfloat16),
                    preferred_element_type=jnp.float32) + b
        if i < n_rest - 1:
            h = jnp.tanh(h)

    out_ref[...] = h.astype(out_ref.dtype)                 # (F, TILE) lane-dense


# ------------------------------- host wrapper --------------------------------
def _pick_block_n(n):
    """Largest convenient lane-dense batch tile (per-tile VMEM is tiny)."""
    if n % 128 != 0:
        return n                       # single full-width tile (block == full dim)
    for cand in (8192, 4096, 2048, 1024, 512, 256, 128):
        if n % cand == 0:
            return cand
    return n


def second_order_augmented_odefunc(t, z, params, *, block_n=None):
    """params: list of (W, b) with W shape (in, out), b shape (out,).

    z: (2*N, F) with F == INPUT_DIM - 1 (required by the module's final cat).
    """
    n2, f = z.shape
    assert n2 % 2 == 0, "z must have an even number of rows (y/v halves)"
    assert f == INPUT_DIM - 1, "state dim must equal input_dim - 1"
    n = n2 // 2

    if block_n is None:
        block_n = _pick_block_n(n)
    assert n % block_n == 0, "block_n must divide the half-batch size"
    grid = (n // block_n,)

    # Feature-major input: rows 0..F-1 are y features, F..2F-1 are v features,
    # batch on the 128-lane axis (layout plumbing only, done once in XLA).
    yv_t = jnp.concatenate(
        [z[:n].T.astype(jnp.float32), z[n:].T.astype(jnp.float32)], axis=0
    )                                                               # (2F, N)

    # First layer: t-column split off, y/v rows fused into one resident weight.
    w1, b1 = params[0]
    w1 = w1.astype(jnp.float32)
    w1_t = w1[0, :].reshape(-1, 1)                                  # (H, 1) f32
    w1_yv = jnp.transpose(w1[1:1 + 2 * f, :]).astype(jnp.bfloat16)  # (H, 2F) bf16
    b1_c = b1.reshape(-1, 1).astype(jnp.float32)                    # (H, 1) f32

    # Remaining layers; the last one is sliced to the used outputs at trace time.
    rest_flat = []
    for idx in range(1, len(params)):
        w, b = params[idx]
        if idx == len(params) - 1:
            w = w[:, :f]
            b = b[:f]
        rest_flat.append(jnp.transpose(w).astype(jnp.bfloat16))     # (out, in)
        rest_flat.append(b.reshape(-1, 1).astype(jnp.float32))      # (out, 1)

    weights = [w1_yv, w1_t, b1_c] + rest_flat

    def _resident_spec(arr):
        nd = arr.ndim
        return pl.BlockSpec(arr.shape, lambda i, _nd=nd: (0,) * _nd)

    in_specs = (
        [pl.BlockSpec(memory_space=pltpu.MemorySpace.SMEM)]          # t scalar
        + [pl.BlockSpec((2 * f, block_n), lambda i: (0, i))]         # yv tile
        + [_resident_spec(w) for w in weights]                       # resident params
    )

    out_t = pl.pallas_call(
        _odefunc_kernel,
        out_shape=jax.ShapeDtypeStruct((f, n), jnp.float32),
        grid=grid,
        in_specs=in_specs,
        out_specs=pl.BlockSpec((f, block_n), lambda i: (0, i)),
        compiler_params=pltpu.CompilerParams(
            dimension_semantics=("parallel",)),
    )(jnp.asarray([t], dtype=jnp.float32), yv_t, *weights)

    # Top half of the result is a pure copy of v == z[n:]; keep it out of the
    # pipelined compute path (wrapper-level concatenate).
    return jnp.concatenate([z[n:], out_t.T.astype(z.dtype)], axis=0)


# ----------------------------- pure-JAX reference -----------------------------
def _reference(t, z, params):
    n = z.shape[0] // 2
    y, v = z[:n], z[n:]
    t_vec = jnp.ones((n, 1), jnp.float32) * t
    h = jnp.concatenate([t_vec, y, v], axis=1)
    for i, (w, b) in enumerate(params):
        h = h @ w + b
        if i < len(params) - 1:
            h = jnp.tanh(h)
    return jnp.concatenate([v, h[:, :INPUT_DIM - 1]], axis=0)


# ----------------------------- parameter init --------------------------------
def _init_params(key):
    """Deterministic PyTorch-style uniform(-1/sqrt(fan_in), 1/sqrt(fan_in)) init."""
    dims = [NET_IN_DIM] + [HIDDEN_DIM] * NUM_LAYERS + [NET_OUT_DIM]
    params = []
    for i in range(len(dims) - 1):
        fan_in, fan_out = dims[i], dims[i + 1]
        key, kw, kb = jax.random.split(key, 3)
        bound = 1.0 / np.sqrt(fan_in)
        w = jax.random.uniform(kw, (fan_in, fan_out), jnp.float32, -bound, bound)
        b = jax.random.uniform(kb, (fan_out,), jnp.float32, -bound, bound)
        params.append((w, b))
    return params


if __name__ == "__main__":
    key = jax.random.PRNGKey(0)
    key, kz = jax.random.split(key)
    params = _init_params(key)
    t = 0.5

    # Lane-dense, multi-tile grid case (4 grid steps of 256 columns each).
    N = 1024
    z = jax.random.normal(kz, (2 * N, STATE_DIM), dtype=jnp.float32)
    out = jax.block_until_ready(second_order_augmented_odefunc(t, z, params,
                                                               block_n=256))
    ref = jax.block_until_ready(_reference(t, z, params))
    assert out.shape == z.shape and out.dtype == z.dtype
    # Loose tolerance: the kernel runs its matmuls with bf16 inputs
    # (f32 accumulation), the reference is pure f32.
    np.testing.assert_allclose(np.asarray(out), np.asarray(ref),
                               rtol=5e-2, atol=5e-2)

    # Small / non-128-aligned batch: single full-array tile fallback.
    key, kz2 = jax.random.split(key)
    z_small = jax.random.normal(kz2, (2 * 8, STATE_DIM), dtype=jnp.float32)
    out_s = jax.block_until_ready(second_order_augmented_odefunc(t, z_small, params))
    ref_s = jax.block_until_ready(_reference(t, z_small, params))
    np.testing.assert_allclose(np.asarray(out_s), np.asarray(ref_s),
                               rtol=5e-2, atol=5e-2)

    print("KERNEL_OK")
</pallas_src>

<mosaic_0001>
module attributes {stable_mosaic.version = 11 : i64} {
  func.func @_odefunc_kernel(%arg0: i32, %arg1: memref<1xf32, #tpu.memory_space<smem>>, %arg2: memref<4x256xf32, #tpu.memory_space<vmem>>, %arg3: memref<32x4xbf16, #tpu.memory_space<vmem>>, %arg4: memref<32x1xf32, #tpu.memory_space<vmem>>, %arg5: memref<32x1xf32, #tpu.memory_space<vmem>>, %arg6: memref<32x32xbf16, #tpu.memory_space<vmem>>, %arg7: memref<32x1xf32, #tpu.memory_space<vmem>>, %arg8: memref<32x32xbf16, #tpu.memory_space<vmem>>, %arg9: memref<32x1xf32, #tpu.memory_space<vmem>>, %arg10: memref<2x32xbf16, #tpu.memory_space<vmem>>, %arg11: memref<2x1xf32, #tpu.memory_space<vmem>>, %arg12: memref<2x256xf32, #tpu.memory_space<vmem>>) attributes {dimension_semantics = [#tpu.dimension_semantics<parallel>], iteration_bounds = array<i64: 4>, scalar_prefetch = 0 : i64, scratch_operands = 0 : i64, tpu.core_type = #tpu.core_type<tc>, window_params = [{transform_indices = @transform_0, window_bounds = array<i64: 1>}, {transform_indices = @transform_1, window_bounds = array<i64: 4, 256>}, {pipeline_mode = #tpu.pipeline_mode<synchronous>, transform_indices = @transform_2, window_bounds = array<i64: 32, 4>}, {pipeline_mode = #tpu.pipeline_mode<synchronous>, transform_indices = @transform_3, window_bounds = array<i64: 32, 1>}, {pipeline_mode = #tpu.pipeline_mode<synchronous>, transform_indices = @transform_4, window_bounds = array<i64: 32, 1>}, {pipeline_mode = #tpu.pipeline_mode<synchronous>, transform_indices = @transform_5, window_bounds = array<i64: 32, 32>}, {pipeline_mode = #tpu.pipeline_mode<synchronous>, transform_indices = @transform_6, window_bounds = array<i64: 32, 1>}, {pipeline_mode = #tpu.pipeline_mode<synchronous>, transform_indices = @transform_7, window_bounds = array<i64: 32, 32>}, {pipeline_mode = #tpu.pipeline_mode<synchronous>, transform_indices = @transform_8, window_bounds = array<i64: 32, 1>}, {pipeline_mode = #tpu.pipeline_mode<synchronous>, transform_indices = @transform_9, window_bounds = array<i64: 2, 32>}, {pipeline_mode = #tpu.pipeline_mode<synchronous>, transform_indices = @transform_10, window_bounds = array<i64: 2, 1>}, {transform_indices = @transform_11, window_bounds = array<i64: 2, 256>}]} {
    %c0 = arith.constant 0 : index
    %0 = memref.load %arg1[%c0] : memref<1xf32, #tpu.memory_space<smem>>
    %c0_0 = arith.constant 0 : index
    %c0_1 = arith.constant 0 : index
    %1 = vector.load %arg5[%c0_0, %c0_1] : memref<32x1xf32, #tpu.memory_space<vmem>>, vector<32x1xf32>
    %c0_2 = arith.constant 0 : index
    %c0_3 = arith.constant 0 : index
    %2 = vector.load %arg4[%c0_2, %c0_3] : memref<32x1xf32, #tpu.memory_space<vmem>>, vector<32x1xf32>
    %3 = vector.broadcast %0 : f32 to vector<32x1xf32>
    %4 = arith.mulf %3, %2 : vector<32x1xf32>
    %5 = arith.addf %1, %4 : vector<32x1xf32>
    %c0_4 = arith.constant 0 : index
    %c0_5 = arith.constant 0 : index
    %6 = vector.load %arg2[%c0_4, %c0_5] : memref<4x256xf32, #tpu.memory_space<vmem>>, vector<4x256xf32>
    %7 = arith.truncf %6 : vector<4x256xf32> to vector<4x256xbf16>
    %c0_6 = arith.constant 0 : index
    %c0_7 = arith.constant 0 : index
    %8 = vector.load %arg3[%c0_6, %c0_7] : memref<32x4xbf16, #tpu.memory_space<vmem>>, vector<32x4xbf16>
    %cst = arith.constant dense<0.000000e+00> : vector<32x256xf32>
    %9 = tpu.matmul %8, %7, %cst {dimension_numbers = #tpu.dot_dimension_numbers<[1], [0], [0], [1], [0, 0, 1, 1], [], []>} : vector<32x4xbf16>, vector<4x256xbf16>, vector<32x256xf32> -> vector<32x256xf32>
    %10 = vector.broadcast %5 : vector<32x1xf32> to vector<32x256xf32>
    %11 = arith.addf %9, %10 : vector<32x256xf32>
    %12 = math.tanh %11 : vector<32x256xf32>
    %c0_8 = arith.constant 0 : index
    %c0_9 = arith.constant 0 : index
    %13 = vector.load %arg6[%c0_8, %c0_9] : memref<32x32xbf16, #tpu.memory_space<vmem>>, vector<32x32xbf16>
    %c0_10 = arith.constant 0 : index
    %c0_11 = arith.constant 0 : index
    %14 = vector.load %arg7[%c0_10, %c0_11] : memref<32x1xf32, #tpu.memory_space<vmem>>, vector<32x1xf32>
    %15 = arith.truncf %12 : vector<32x256xf32> to vector<32x256xbf16>
    %cst_12 = arith.constant dense<0.000000e+00> : vector<32x256xf32>
    %16 = tpu.matmul %13, %15, %cst_12 {dimension_numbers = #tpu.dot_dimension_numbers<[1], [0], [0], [1], [0, 0, 1, 1], [], []>} : vector<32x32xbf16>, vector<32x256xbf16>, vector<32x256xf32> -> vector<32x256xf32>
    %17 = vector.broadcast %14 : vector<32x1xf32> to vector<32x256xf32>
    %18 = arith.addf %16, %17 : vector<32x256xf32>
    %19 = math.tanh %18 : vector<32x256xf32>
    %c0_13 = arith.constant 0 : index
    %c0_14 = arith.constant 0 : index
    %20 = vector.load %arg8[%c0_13, %c0_14] : memref<32x32xbf16, #tpu.memory_space<vmem>>, vector<32x32xbf16>
    %c0_15 = arith.constant 0 : index
    %c0_16 = arith.constant 0 : index
    %21 = vector.load %arg9[%c0_15, %c0_16] : memref<32x1xf32, #tpu.memory_space<vmem>>, vector<32x1xf32>
    %22 = arith.truncf %19 : vector<32x256xf32> to vector<32x256xbf16>
    %cst_17 = arith.constant dense<0.000000e+00> : vector<32x256xf32>
    %23 = tpu.matmul %20, %22, %cst_17 {dimension_numbers = #tpu.dot_dimension_numbers<[1], [0], [0], [1], [0, 0, 1, 1], [], []>} : vector<32x32xbf16>, vector<32x256xbf16>, vector<32x256xf32> -> vector<32x256xf32>
    %24 = vector.broadcast %21 : vector<32x1xf32> to vector<32x256xf32>
    %25 = arith.addf %23, %24 : vector<32x256xf32>
    %26 = math.tanh %25 : vector<32x256xf32>
    %c0_18 = arith.constant 0 : index
    %c0_19 = arith.constant 0 : index
    %27 = vector.load %arg10[%c0_18, %c0_19] : memref<2x32xbf16, #tpu.memory_space<vmem>>, vector<2x32xbf16>
    %c0_20 = arith.constant 0 : index
    %c0_21 = arith.constant 0 : index
    %28 = vector.load %arg11[%c0_20, %c0_21] : memref<2x1xf32, #tpu.memory_space<vmem>>, vector<2x1xf32>
    %29 = arith.truncf %26 : vector<32x256xf32> to vector<32x256xbf16>
    %cst_22 = arith.constant dense<0.000000e+00> : vector<2x256xf32>
    %30 = tpu.matmul %27, %29, %cst_22 {dimension_numbers = #tpu.dot_dimension_numbers<[1], [0], [0], [1], [0, 0, 1, 1], [], []>} : vector<2x32xbf16>, vector<32x256xbf16>, vector<2x256xf32> -> vector<2x256xf32>
    %31 = vector.broadcast %28 : vector<2x1xf32> to vector<2x256xf32>
    %32 = arith.addf %30, %31 : vector<2x256xf32>
    %c0_23 = arith.constant 0 : index
    %c0_24 = arith.constant 0 : index
    %33 = vector.load %arg12[%c0_23, %c0_24] : memref<2x256xf32, #tpu.memory_space<vmem>>, vector<2x256xf32>
    tpu.vector_store %arg12[%c0_23, %c0_24], %32 {strides = array<i32>} : memref<2x256xf32, #tpu.memory_space<vmem>>, vector<2x256xf32>,
    return
  }
  func.func @transform_0(%arg0: i32) -> i32 {
    %c0_i32 = arith.constant 0 : i32
    %c0_i32_0 = arith.constant 0 : i32
    return %c0_i32 : i32
  }
  func.func @transform_1(%arg0: i32) -> (i32, i32) {
    %c0_i32 = arith.constant 0 : i32
    %c0_i32_0 = arith.constant 0 : i32
    return %c0_i32, %arg0 : i32, i32
  }
  func.func @transform_2(%arg0: i32) -> (i32, i32) {
    %c0_i32 = arith.constant 0 : i32
    %c0_i32_0 = arith.constant 0 : i32
    %c0_i32_1 = arith.constant 0 : i32
    return %c0_i32, %c0_i32_0 : i32, i32
  }
  func.func @transform_3(%arg0: i32) -> (i32, i32) {
    %c0_i32 = arith.constant 0 : i32
    %c0_i32_0 = arith.constant 0 : i32
    %c0_i32_1 = arith.constant 0 : i32
    return %c0_i32, %c0_i32_0 : i32, i32
  }
  func.func @transform_4(%arg0: i32) -> (i32, i32) {
    %c0_i32 = arith.constant 0 : i32
    %c0_i32_0 = arith.constant 0 : i32
    %c0_i32_1 = arith.constant 0 : i32
    return %c0_i32, %c0_i32_0 : i32, i32
  }
  func.func @transform_5(%arg0: i32) -> (i32, i32) {
    %c0_i32 = arith.constant 0 : i32
    %c0_i32_0 = arith.constant 0 : i32
    %c0_i32_1 = arith.constant 0 : i32
    return %c0_i32, %c0_i32_0 : i32, i32
  }
  func.func @transform_6(%arg0: i32) -> (i32, i32) {
    %c0_i32 = arith.constant 0 : i32
    %c0_i32_0 = arith.constant 0 : i32
    %c0_i32_1 = arith.constant 0 : i32
    return %c0_i32, %c0_i32_0 : i32, i32
  }
  func.func @transform_7(%arg0: i32) -> (i32, i32) {
    %c0_i32 = arith.constant 0 : i32
    %c0_i32_0 = arith.constant 0 : i32
    %c0_i32_1 = arith.constant 0 : i32
    return %c0_i32, %c0_i32_0 : i32, i32
  }
  func.func @transform_8(%arg0: i32) -> (i32, i32) {
    %c0_i32 = arith.constant 0 : i32
    %c0_i32_0 = arith.constant 0 : i32
    %c0_i32_1 = arith.constant 0 : i32
    return %c0_i32, %c0_i32_0 : i32, i32
  }
  func.func @transform_9(%arg0: i32) -> (i32, i32) {
    %c0_i32 = arith.constant 0 : i32
    %c0_i32_0 = arith.constant 0 : i32
    %c0_i32_1 = arith.constant 0 : i32
    return %c0_i32, %c0_i32_0 : i32, i32
  }
  func.func @transform_10(%arg0: i32) -> (i32, i32) {
    %c0_i32 = arith.constant 0 : i32
    %c0_i32_0 = arith.constant 0 : i32
    %c0_i32_1 = arith.constant 0 : i32
    return %c0_i32, %c0_i32_0 : i32, i32
  }
  func.func @transform_11(%arg0: i32) -> (i32, i32) {
    %c0_i32 = arith.constant 0 : i32
    %c0_i32_0 = arith.constant 0 : i32
    return %c0_i32, %arg0 : i32, i32
  }
}

</mosaic_0001>

<bundles_post_ra>
// kernel: tpu_custom_call.1
= control target key start
LH: loop header
LB: loop body
LE: loop exit
PB: predicated region body
PF: predicated region fallthrough
CT: control target
= control target key end

     0   :  { %s1326_s0 = inlined_call_operand.<no memory space> [shape: f32[1], index: 0, kind: input, shape index: {}]   ;;  %s1327_s1 = inlined_call_operand.vmem [shape: f32[4,1024], index: 1, kind: input, shape index: {}]   ;;  %s1328_s2 = inlined_call_operand.vmem [shape: bf16[32,4], index: 2, kind: input, shape index: {}]   ;;  %s1329_s3 = inlined_call_operand.vmem [shape: f32[32,1], index: 3, kind: input, shape index: {}]   ;;  %s1330_s4 = inlined_call_operand.vmem [shape: f32[32,1], index: 4, kind: input, shape index: {}]   ;;  %s1331_s5 = inlined_call_operand.vmem [shape: bf16[32,32], index: 5, kind: input, shape index: {}]   ;;  %s1332_s6 = inlined_call_operand.vmem [shape: f32[32,1], index: 6, kind: input, shape index: {}]   ;;  %s1333_s7 = inlined_call_operand.vmem [shape: bf16[32,32], index: 7, kind: input, shape index: {}]   ;;  %s1334_s8 = inlined_call_operand.vmem [shape: f32[32,1], index: 8, kind: input, shape index: {}]   ;;  %s1335_s9 = inlined_call_operand.vmem [shape: bf16[2,32], index: 9, kind: input, shape index: {}]   ;;  %s1336_s10 = inlined_call_operand.vmem [shape: f32[2,1], index: 10, kind: input, shape index: {}]   ;;  %s1337_s11 = inlined_call_operand.hbm [shape: f32[2,1024], index: 11, kind: output, shape index: {}]  }
   0x1   :  { %16 = sst [smem:[#allocation2]] %s1326_s0 }
   0x2   :  { %17 = vsyncpa [#allocation4], 0 }
   0x3   :  { %19 = vsyncpa [#allocation4 + $0x1], 0  ;;  %s1137_s19 = smov 0   ;;  %s1139_s20 = smov 0  }
   0x4   :  { %s1141_s21 = smov 0   ;;  %s1143_s22 = smov 0  }
   0x5 LB: > { %1339 = sst [smem:[#allocation6_spill]] %s1066_s21  ;;  %s1158_s0 = sadd.s32 4294967295, %s1070_s22   ;;  %s1070_s22 = sphi %s1143_s22, %s1347_s22   ;;  %s1066_s21 = sphi %s1141_s21, %s1344_s21   ;;  %s1062_s20 = sphi %s1139_s20, %s1346_s20   ;;  %s1058_s19 = sphi %s1137_s19, %s1345_s19  }
   0x6   : > { %s883_s23 = sadd.s32 4294967294, %s1070_s22   ;;  %s1162_s24 = sadd.s32 1, %s1070_s22  }
   0x7   : > { %s268_s25 = sadd.s32 1, %s1066_s21  ;;  %s265_s26 = ssub.s32 %s1070_s22, %s1162_s24 }
   0x8   : > { %p278_p0 = scmp.ne.s32.totalorder %s1066_s21, %s1062_s20  ;;  %p266_p1 = scmp.eq.s32.totalorder %s265_s26, 0 }
   0x9   : > { %p279_p2 = scmp.eq.s32.totalorder %s1158_s0, 3  ;;  %p284_p3 = scmp.ne.s32.totalorder %s1062_s20, %s1058_s19 }
   0xa   : > { %p285_p4 = scmp.eq.s32.totalorder %s883_s23, 3  ;;  %p886_p7 = scmp.ge.s32.totalorder %s1070_s22, 1 }
   0xb   : > { %s1173_s27 = scalar_select %p266_p1, %s1066_s21, %s268_s25  }
   0xc   : > { %p1175_p5 = por %p279_p2, %p278_p0  ;;  %p1179_p6 = por %p285_p4, %p284_p3 }
   0xd   : > { %1340 = sst [smem:[#allocation7_spill]] %s1173_s27  ;;  %p342_p8 = scmp.lt.s32.totalorder %s1070_s22, 5 }
   0xf   : > { %p343_p9 = pnand %p886_p7, %p342_p8 }
  0x10   : > { %s888_s30 = sshll.u32 (!%p343_p9), %s1158_s0, 1  ;;  %v1072_v0 = vmov (!%p343_p9), 0   ;;  %s390_s12 = sld [smem:[#allocation2]] (!%p343_p9)  ;;  %v395_v1 = vld [vmem:[%s1329_s3] sm:$0xff] (!%p343_p9)  ;;  %v396_v2 = vld [vmem:[%s1329_s3 + $0x8] sm:$0xff] (!%p343_p9)  ;;  %v397_v3 = vld [vmem:[%s1329_s3 + $0x10] sm:$0xff] (!%p343_p9) }
  0x11   : > { %346 = sbr.rel (%p343_p9) target bundleno = 993 (0x3e1), region = 64  ;;  %p383_p10 = scmp.lt.s32.totalorder (!%p343_p9), %s888_s30, 7  ;;  %494 = vmatprep.mubr.bf16.mxu0 (!%p343_p9), %v1072_v0  ;;  %951 = vset.pattern.permute.xlu0 (!%p343_p9), %v1072_v0  ;;  %vm455_vm0 = vcmask (!%p343_p9), 1041408   ;;  %v398_v5 = vld [vmem:[%s1329_s3 + $0x18] sm:$0xff] (!%p343_p9)  ;;  %v391_v8 = vld [vmem:[%s1330_s4] sm:$0xff] (!%p343_p9)  ;;  %v393_v10 = vld [vmem:[%s1330_s4 + $0x10] sm:$0xff] (!%p343_p9) }
  0x12   : > { %952 = vset.pattern.permute.xlu1 (!%p343_p9), %v1072_v0  ;;  %604 = vmatprep.mubr.bf16.mxu1 (!%p343_p9), %v1072_v0  ;;  %v392_v16 = vld [vmem:[%s1330_s4 + $0x8] sm:$0xff] (!%p343_p9)  ;;  %v394_v20 = vld [vmem:[%s1330_s4 + $0x18] sm:$0xff] (!%p343_p9)  ;;  %v954_v21 = vld [vmem:[%s1328_s2] sm:$0xff] (!%p343_p9)   ;;  %vm448_vm1 = vcmask (!%p343_p9), 31744   ;;  %vm565_vm2 = vcmask (!%p343_p9), 261120   ;;  %s379_s14 = sand.u32 (!%p343_p9), 1, %s1062_s20  }
  0x13   : > { %v527_v24 = vld [vmem:[%s1332_s6] sm:$0xff] (!%p343_p9)  ;;  %v528_v25 = vld [vmem:[%s1332_s6 + $0x8] sm:$0xff] (!%p343_p9)  ;;  %v529_v27 = vld [vmem:[%s1332_s6 + $0x10] sm:$0xff] (!%p343_p9)  ;;  %s887_s15 = sshll.u32 (!%p343_p9), %s379_s14, 2  ;;  %s910_s17 = sshll.u32 (!%p343_p9), %s1158_s0, 6 }
  0x14   : > { %v955_v26 = vld [vmem:[%s1328_s2 + $0x8] sm:$0xff] (!%p343_p9)   ;;  %v530_v28 = vld [vmem:[%s1332_s6 + $0x18] sm:$0xff] (!%p343_p9)  ;;  %v637_v29 = vld [vmem:[%s1334_s8] sm:$0xff] (!%p343_p9)  ;;  %s381_s27 = scalar_lea.vmem (!%p343_p9), [#allocation3], %s887_s15  ;;  %s810_s23 = scalar_lea.sflag (!%p343_p9), [#allocation4], %s379_s14 }
  0x15   : > { %v638_v30 = vld [vmem:[%s1334_s8 + $0x8] sm:$0xff] (!%p343_p9)  ;;  %v639_v31 = vld [vmem:[%s1334_s8 + $0x10] sm:$0xff] (!%p343_p9)  ;;  %v640_v32 = vld [vmem:[%s1334_s8 + $0x18] sm:$0xff] (!%p343_p9)  ;;  %s824_s21 = sshll.u32 (!%p343_p9), %s381_s27, 4  ;;  %s1073_s0 = smov (!%p343_p9), [#allocation3]   ;;  %s1286_s21 = int_to_ptr.vmem [resolvable:$true] %s824_s21 }
  0x16   : > { %v399_v9 = vstv (!%p343_p9), %s390_s12  ;;  %v743_v33 = vld [vmem:[%s1336_s10] sm:$0x3] (!%p343_p9)  ;;  %s1284_s12 = scalar_lea.hbm (!%p343_p9), %s1337_s11, %s910_s17  ;;  %s1008_s25 = scalar_lea.vmem (!%p343_p9), %s1286_s21, 64 }
  0x17   : > { %v400_v11 = vmul.f32 (!%p343_p9), %v399_v9, %v395_v1  ;;  %v401_v12 = vmul.f32 (!%p343_p9), %v399_v9, %v396_v2  ;;  %v402_v13 = vmul.f32 (!%p343_p9), %v399_v9, %v397_v3  ;;  %v403_v17 = vmul.f32 (!%p343_p9), %v399_v9, %v398_v5  ;;  %v956_v3 = vld [vmem:[%s1331_s5] sm:$0xff] (!%p343_p9)   ;;  %p1009_p11 = scmp.ne.s32.totalorder (!%p343_p9), %s1286_s21, %s1008_s25  ;;  %s1012_s26 = sshll.u32 (!%p343_p9), %s1073_s0, 4  ;;  %s1013_s26 = int_to_ptr.vmem [resolvable:$false] %s1012_s26 }
  0x18   : > { %s1349_s30 = smov (!%p383_p10, %s888_s30), 7  ;;  %p1015_p0 = scmp.lt.s32.totalorder %s1286_s21, %s1013_s26 }
  0x19   : > { %s889_s13 = sshll.u32 %s1349_s30, 2  ;;  %v404_v18 = vadd.f32 %v400_v11, %v391_v8  ;;  %v406_v19 = vadd.f32 %v402_v13, %v393_v10  ;;  %v405_v22 = vadd.f32 %v401_v12, %v392_v16  ;;  %v407_v23 = vadd.f32 %v403_v17, %v394_v20  ;;  %p1010_p12 = pnand %p1009_p11, %p1175_p5 }
  0x1a   : > { %s386_s16 = scalar_lea.vmem %s1327_s1, %s889_s13  ;;  %s1014_s30 = scalar_lea.vmem %s1013_s26, 128 }
  0x1b   : > { %v408_v4 = vld [vmem:[%s386_s16] sm:$0xff]  ;;  %420 = vperm.xlu0 %951, %v404_v18   ;;  %430 = vperm.xlu1 %952, %v406_v19   ;;  %p1011_p13 = pneg %p1010_p12  ;;  %p1016_p1 = scmp.lt.s32.totalorder %s1014_s30, %s1008_s25 }
  0x1c   : > { %v410_v6 = vcombine.high %v408_v4, %v408_v4  ;;  %v412_v7 = vpack.c.bf16 %v408_v4, %v408_v4  ;;  %v957_v4 = vld [vmem:[%s1331_s5 + $0x8] sm:$0xff]  }
  0x1d   : > { %p1017_p2 = por %p1016_p1, %p1015_p0 }
  0x1e   : > { %v413_v14 = vpack.c.bf16 %v410_v6, %v410_v6  ;;  %v457_v15 = vsel %vm455_vm0, %v412_v7, 0 }
  0x1f   : > { %425 = vperm.xlu0 %951, %v405_v22   ;;  %435 = vperm.xlu1 %952, %v407_v23   ;;  %p1018_p3 = pnand %p1017_p2, %p1011_p13 }
  0x20   : > { %892 = vmatprep.subr.msk.bf16.mxu0 %vm455_vm0, %v413_v14 }
  0x21   : > { %463 = vmatpush1.bf16.msra.mxu0 %v457_v15 }
  0x23   : > { %537 = vperm.xlu0 %951, %v527_v24   ;;  %542 = vperm.xlu1 %952, %v528_v25  }
  0x24   : > { %893 = vmatmul.mubr.msk.bf16.vlgmr.msra.gmra.mrb[0].mxu0 %vm448_vm1, %v954_v21 }
  0x25   : > { %504 = vmatprep.mubr.bf16.mxu0 %v1072_v0 }
  0x27   : > { %547 = vperm.xlu0 %951, %v529_v27   ;;  %552 = vperm.xlu1 %952, %v530_v28  }
  0x2b   : > { %647 = vperm.xlu0 %951, %v637_v29   ;;  %652 = vperm.xlu1 %952, %v638_v30  }
  0x2c   : > { %894 = vmatmul.mubr.msk.bf16.gmra.mrb[4].mxu0 %vm448_vm1, %v955_v26 }
  0x2d   : > { %713 = vmatprep.mubr.bf16.mxu0 %v1072_v0 }
  0x2f   : > { %657 = vperm.xlu0 %951, %v639_v31   ;;  %662 = vperm.xlu1 %952, %v640_v32  }
  0x33   : > { %750 = vperm.xlu0 %951, %v743_v33  }
  0x9a   : > { %v421_v34 = vpop.permute.xlu0 %420  ;;  %v431_v43 = vpop.permute.xlu1 %430 }
  0x9e   : > { %v426_v38 = vpop.permute.xlu0 %425  ;;  %v436_v48 = vpop.permute.xlu1 %435 }
  0xa2   : > { %v538_v5 = vpop.permute.xlu0 %537  ;;  %v543_v9 = vpop.permute.xlu1 %542 }
  0xa6   : > { %v548_v15 = vpop.permute.xlu0 %547  ;;  %v553_v19 = vpop.permute.xlu1 %552 }
  0xf7   : > { %v496_v35 = vpop.f32.mrb[0].mxu0 }
  0xf8   : > { %v497_v36 = vadd.f32 %v496_v35, %v421_v34  ;;  %v498_v37 = vpop.f32.mrb[1].mxu0 }
  0xf9   : > { %v499_v39 = vadd.f32 %v498_v37, %v421_v34  ;;  %v500_v40 = vpop.f32.mrb[2].mxu0  ;;  %v958_v37 = vld [vmem:[%s1333_s7] sm:$0xff]  }
  0xfa   : > { %960 = vtanh.f32 %v497_v36  ;;  %v501_v41 = vadd.f32 %v500_v40, %v426_v38  ;;  %v502_v42 = vpop.f32.mrb[3].mxu0 }
  0xfb   : > { %962 = vtanh.f32 %v499_v39  ;;  %v503_v44 = vadd.f32 %v502_v42, %v426_v38  ;;  %v959_v38 = vld [vmem:[%s1333_s7 + $0x8] sm:$0xff]   ;;  %v648_v39 = vpop.permute.xlu0 %647 }
  0xfc   : > { %964 = vtanh.f32 %v501_v41 }
  0xfd   : > { %966 = vtanh.f32 %v503_v44 }
  0xff   : > { %v506_v45 = vpop.f32.mrb[4].mxu0 }
 0x100   : > { %v507_v46 = vadd.f32 %v506_v45, %v431_v43  ;;  %v508_v47 = vpop.f32.mrb[5].mxu0 }
 0x101   : > { %v509_v49 = vadd.f32 %v508_v47, %v431_v43  ;;  %v510_v50 = vpop.f32.mrb[6].mxu0  ;;  %v653_v43 = vpop.permute.xlu1 %652 }
 0x102   : > { %968 = vtanh.f32 %v507_v46  ;;  %v511_v51 = vadd.f32 %v510_v50, %v436_v48  ;;  %v512_v52 = vpop.f32.mrb[7].mxu0 }
 0x103   : > { %970 = vtanh.f32 %v509_v49  ;;  %v513_v53 = vadd.f32 %v512_v52, %v436_v48 }
 0x104   : > { %v961_v54 = vpop.eup %960  ;;  %972 = vtanh.f32 %v511_v51 }
 0x105   : > { %v963_v55 = vpop.eup %962  ;;  %974 = vtanh.f32 %v513_v53  ;;  %v663_v52 = vpop.permute.xlu1 %662 }
 0x106   : > { %v965_v56 = vpop.eup %964 }
 0x107   : > { %v967_v57 = vpop.eup %966  ;;  %v531_v58 = vpack.c.bf16 %v965_v56, %v961_v54 }
 0x108   : > { %v532_v59 = vpack.c.bf16 %v967_v57, %v963_v55 }
 0x10a   : > { %572 = vmatprep.subr.bf16.mxu1 %v532_v59 }
 0x10b   : > { %573 = vmatpush1.bf16.msra.mxu1 %v531_v58 }
 0x10c   : > { %v969_v60 = vpop.eup %968 }
 0x10d   : > { %v971_v61 = vpop.eup %970 }
 0x10e   : > { %v973_v62 = vpop.eup %972 }
 0x10f   : > { %v975_v63 = vpop.eup %974  ;;  %v533_v1 = vpack.c.bf16 %v973_v62, %v969_v60 }
 0x110   : > { %v534_v2 = vpack.c.bf16 %v975_v63, %v971_v61 }
 0x112   : > { %574 = vmatprep.subr.bf16.mxu1 %v534_v2 }
 0x113   : > { %575 = vmatpush1.bf16.msra.mxu1 %v533_v1 }
 0x116   : > { %897 = vmatmul.mubr.msk.bf16.vlgmr.msra.gmra.mrb[0].mxu1 %vm565_vm2, %v956_v3 }
 0x117   : > { %614 = vmatprep.mubr.bf16.mxu1 %v1072_v0 }
 0x11e   : > { %898 = vmatmul.mubr.msk.bf16.gmra.mrb[4].mxu1 %vm565_vm2, %v957_v4 }
 0x11f   : > { %788 = vmatprep.mubr.bf16.mxu1 %v1072_v0 }
 0x1e9   : > { %v606_v6 = vpop.f32.mrb[0].mxu1 }
 0x1ea   : > { %v607_v7 = vadd.f32 %v606_v6, %v538_v5  ;;  %v608_v8 = vpop.f32.mrb[1].mxu1 }
 0x1eb   : > { %v609_v10 = vadd.f32 %v608_v8, %v538_v5  ;;  %v610_v11 = vpop.f32.mrb[2].mxu1 }
 0x1ec   : > { %976 = vtanh.f32 %v607_v7  ;;  %v611_v12 = vadd.f32 %v610_v11, %v543_v9  ;;  %v612_v13 = vpop.f32.mrb[3].mxu1  ;;  %v742_v7 = vld [vmem:[%s1335_s9] sm:$0x1] }
 0x1ed   : > { %978 = vtanh.f32 %v609_v10  ;;  %v613_v14 = vadd.f32 %v612_v13, %v543_v9 }
 0x1ee   : > { %980 = vtanh.f32 %v611_v12 }
 0x1ef   : > { %982 = vtanh.f32 %v613_v14 }
 0x1f1   : > { %v616_v16 = vpop.f32.mrb[4].mxu1 }
 0x1f2   : > { %v617_v17 = vadd.f32 %v616_v16, %v548_v15  ;;  %v618_v18 = vpop.f32.mrb[5].mxu1 }
 0x1f3   : > { %v619_v20 = vadd.f32 %v618_v18, %v548_v15  ;;  %v620_v21 = vpop.f32.mrb[6].mxu1 }
 0x1f4   : > { %984 = vtanh.f32 %v617_v17  ;;  %v621_v22 = vadd.f32 %v620_v21, %v553_v19  ;;  %v622_v23 = vpop.f32.mrb[7].mxu1 }
 0x1f5   : > { %986 = vtanh.f32 %v619_v20  ;;  %v623_v24 = vadd.f32 %v622_v23, %v553_v19 }
 0x1f6   : > { %v977_v25 = vpop.eup %976  ;;  %988 = vtanh.f32 %v621_v22 }
 0x1f7   : > { %v979_v26 = vpop.eup %978  ;;  %990 = vtanh.f32 %v623_v24 }
 0x1f8   : > { %v981_v27 = vpop.eup %980 }
 0x1f9   : > { %v983_v28 = vpop.eup %982  ;;  %v641_v29 = vpack.c.bf16 %v981_v27, %v977_v25 }
 0x1fa   : > { %v642_v30 = vpack.c.bf16 %v983_v28, %v979_v26 }
 0x1fc   : > { %681 = vmatprep.subr.bf16.mxu0 %v642_v30 }
 0x1fd   : > { %682 = vmatpush1.bf16.msra.mxu0 %v641_v29 }
 0x1fe   : > { %v985_v31 = vpop.eup %984 }
 0x1ff   : > { %v987_v32 = vpop.eup %986 }
 0x200   : > { %v989_v33 = vpop.eup %988 }
 0x201   : > { %v991_v34 = vpop.eup %990  ;;  %v643_v35 = vpack.c.bf16 %v989_v33, %v985_v31 }
 0x202   : > { %v644_v36 = vpack.c.bf16 %v991_v34, %v987_v32 }
 0x204   : > { %683 = vmatprep.subr.bf16.mxu0 %v644_v36 }
 0x205   : > { %684 = vmatpush1.bf16.msra.mxu0 %v643_v35 }
 0x208   : > { %901 = vmatmul.mubr.msk.bf16.vlgmr.msra.gmra.mrb[8].mxu0 %vm565_vm2, %v958_v37 }
 0x209   : > { %723 = vmatprep.mubr.bf16.mxu0 %v1072_v0  ;;  %v658_v0 = vpop.permute.xlu0 %657 }
 0x20d   : > { %v751_v8 = vpop.permute.xlu0 %750 }
 0x210   : > { %902 = vmatmul.mubr.msk.bf16.gmra.mrb[12].mxu0 %vm565_vm2, %v959_v38 }
 0x2db   : > { %v715_v40 = vpop.f32.mrb[8].mxu0 }
 0x2dc   : > { %v716_v41 = vadd.f32 %v715_v40, %v648_v39  ;;  %v717_v42 = vpop.f32.mrb[9].mxu0 }
 0x2dd   : > { %v718_v44 = vadd.f32 %v717_v42, %v648_v39  ;;  %v719_v45 = vpop.f32.mrb[10].mxu0 }
 0x2de   : > { %992 = vtanh.f32 %v716_v41  ;;  %v720_v46 = vadd.f32 %v719_v45, %v653_v43  ;;  %v721_v47 = vpop.f32.mrb[11].mxu0 }
 0x2df   : > { %994 = vtanh.f32 %v718_v44  ;;  %v722_v48 = vadd.f32 %v721_v47, %v653_v43 }
 0x2e0   : > { %996 = vtanh.f32 %v720_v46 }
 0x2e1   : > { %998 = vtanh.f32 %v722_v48 }
 0x2e3   : > { %v725_v49 = vpop.f32.mrb[12].mxu0 }
 0x2e4   : > { %v726_v50 = vadd.f32 %v725_v49, %v658_v0  ;;  %v727_v51 = vpop.f32.mrb[13].mxu0 }
 0x2e5   : > { %v728_v53 = vadd.f32 %v727_v51, %v658_v0  ;;  %v729_v54 = vpop.f32.mrb[14].mxu0 }
 0x2e6   : > { %1000 = vtanh.f32 %v726_v50  ;;  %v730_v55 = vadd.f32 %v729_v54, %v663_v52  ;;  %v731_v56 = vpop.f32.mrb[15].mxu0 }
 0x2e7   : > { %1002 = vtanh.f32 %v728_v53  ;;  %v732_v57 = vadd.f32 %v731_v56, %v663_v52 }
 0x2e8   : > { %v993_v58 = vpop.eup %992  ;;  %1004 = vtanh.f32 %v730_v55 }
 0x2e9   : > { %v995_v59 = vpop.eup %994  ;;  %1006 = vtanh.f32 %v732_v57 }
 0x2ea   : > { %v997_v60 = vpop.eup %996 }
 0x2eb   : > { %v999_v61 = vpop.eup %998  ;;  %v744_v62 = vpack.c.bf16 %v997_v60, %v993_v58 }
 0x2ec   : > { %v745_v63 = vpack.c.bf16 %v999_v61, %v995_v59 }
 0x2ee   : > { %756 = vmatprep.subr.bf16.mxu1 %v745_v63 }
 0x2ef   : > { %757 = vmatpush1.bf16.msra.mxu1 %v744_v62 }
 0x2f0   : > { %v1001_v1 = vpop.eup %1000 }
 0x2f1   : > { %v1003_v2 = vpop.eup %1002 }
 0x2f2   : > { %v1005_v3 = vpop.eup %1004 }
 0x2f3   : > { %v1007_v4 = vpop.eup %1006  ;;  %v746_v5 = vpack.c.bf16 %v1005_v3, %v1001_v1 }
 0x2f4   : > { %v747_v6 = vpack.c.bf16 %v1007_v4, %v1003_v2 }
 0x2f6   : > { %758 = vmatprep.subr.bf16.mxu1 %v747_v6 }
 0x2f7   : > { %759 = vmatpush1.bf16.msra.mxu1 %v746_v5 }
 0x2fa   : > { %903 = vmatmul.mubr.msk.bf16.vlgmr.msra.gmra.mrb[8].mxu1 %vm565_vm2, %v742_v7 }
 0x3cd   : > { %v790_v9 = vpop.f32.mrb[8].mxu1 }
 0x3ce   : > { %v791_v10 = vadd.f32 %v790_v9, %v751_v8  ;;  %v792_v11 = vpop.f32.mrb[9].mxu1 }
 0x3cf   : > { %v793_v12 = vadd.f32 %v792_v11, %v751_v8  ;;  %v794_v13 = vpop.f32.mrb[10].mxu1 }
 0x3d0   : > { %v795_v14 = vpop.f32.mrb[11].mxu1 }
 0x3d1   : > { %v799_v15 = vcombine.low %v791_v10, %v793_v12 }
 0x3d3   : > { %904 = vst.sshfl [vmem:[%s381_s27] sm:$0x33 pattern:$0x76325410] %v799_v15 }
 0x3d4   : > { %1021 = shalt.err (!%p1018_p3)
}
 0x3d5   : > { %s1022_s13 = scalar_lea.hbm %s1284_s12, 64  ;;  %s1026_s17 = scalar_lea.hbm %s1337_s11, 256 }
 0x3d6   : > { %p1023_p4 = scmp.ne.s32.totalorder %s1284_s12, %s1022_s13  ;;  %p1027_p9 = scmp.lt.u32.totalorder %s1284_s12, %s1337_s11 }
 0x3d7   : > { %p1028_p10 = scmp.lt.u32.totalorder %s1026_s17, %s1022_s13  ;;  %p1030_p12 = scmp.lt.u32.totalorder %s1022_s13, %s1284_s12 }
 0x3d8   : > { %p1024_p7 = pnand %p1023_p4, %p1175_p5 }
 0x3d9   : > { %p1029_p11 = por %p1028_p10, %p1027_p9 }
 0x3da   : > { %p1025_p8 = pneg %p1024_p7 }
 0x3db   : > { %p1031_p13 = por %p1030_p12, %p1029_p11 }
 0x3dd   : > { %p1032_p0 = pnand %p1031_p13, %p1025_p8 }
 0x3df   : > { %1035 = shalt.err (!%p1032_p0)
}
 0x3e0   : > { %911 = dma.vmem_to_hbm [thread:$0]  (%p1175_p5), %s1286_s21, 64, %s1284_s12, %s810_s23  }
 0x3e1 PF: > { %p917_p1 = scmp.ge.s32.totalorder %s1070_s22, 2  ;;  %s836_s18 = sand.u32 1, %s1058_s19  }
 0x3e2   : > { %s837_s25 = scalar_lea.sflag [#allocation4], %s836_s18 }
 0x3e3   : > { %p914_p2 = pnand %p917_p1, %p1179_p6 }
 0x3e5   : > { %1053 = dma.done.wait (!%p914_p2), %s837_s25, 64  }
 0x3e6   : > { %1055 = vsyncadd (!%p914_p2), %s837_s25, 4294967232  ;;  %s1343_s0 = sld [smem:[#allocation6_spill]]  ;;  %s1344_s21 = sld [smem:[#allocation7_spill]] }
 0x3e7   : > { %p22_p3 = scmp.ge.s32.totalorder %s1162_s24, 6   ;;  %s1345_s19 = smov %s1062_s20 }
 0x3e8   : > { %s1347_s22 = smov %s1162_s24 }
 0x3e9   :  { %24 = sbr.rel (!%p22_p3) target bundleno = 5 (0x5), region = 99 }
 0x3ec   : > { %s1346_s20 = smov %s1343_s0 }
 0x3f0   :  { %842 = vsyncpa [#allocation4], 1 }
 0x3f1   :  { %844 = vsyncpa [#allocation4 + $0x1], 1 }

</bundles_post_ra>
